<compile_context>
chip_gen: v6e
topology: v6e:2x2x1
jax: 0.10.0
libtpu: 0.0.40
codegen_flags: <defaults>
</compile_context>

<pallas_src>
import functools

import numpy as np
import jax
import jax.numpy as jnp
from jax.experimental import pallas as pl
from jax.experimental.pallas import tpu as pltpu  # noqa: F401  (TPU backend import)


LANE = 128   # lane width: out_dim / hidden / K are padded to multiples of this
HIDP = 128   # hidden dim padded to one full lane width


# --------------------------------------------------------------------------------------
# Offline (NumPy, float64) construction of the composed pooling / linear-prefix matrices
# --------------------------------------------------------------------------------------
def _adaptive_avg_pool_matrix(in_size: int, out_size: int) -> np.ndarray:
    """A (out,in) such that A @ v == AdaptiveAvgPool1d(v, out) (PyTorch semantics)."""
    A = np.zeros((out_size, in_size), dtype=np.float64)
    for i in range(out_size):
        start = (i * in_size) // out_size
        end = -((-(i + 1) * in_size) // out_size)  # ceil((i+1)*in/out)
        A[i, start:end] = 1.0 / (end - start)
    return A


# --------------------------------------------------------------------------------------
# Single fused Pallas kernel:
#   (prefix-folded Linear) -> ReLU -> Linear -> ReLU -> Linear    (all lane-dense, bf16)
# --------------------------------------------------------------------------------------
def _fused_forward_kernel(x_ref, w_ref, b_ref, o_ref, *, k_pad, hidp):
    # x_ref : (B, k_pad)              bf16
    # w_ref : (k_pad + 2*hidp, hidp)  bf16  -- [w_pre ; w2 ; w_last] stacked on rows
    # b_ref : (3, hidp)               f32   -- [b_pre ; b2 ; b_last]
    # o_ref : (B, hidp)               f32   -- lane-dense padded output
    b = b_ref[...]
    w_pre = w_ref[0:k_pad, :]
    w2 = w_ref[k_pad:k_pad + hidp, :]
    wl = w_ref[k_pad + hidp:k_pad + 2 * hidp, :]

    h = jnp.dot(x_ref[...], w_pre, preferred_element_type=jnp.float32) + b[0:1, :]
    h = jnp.maximum(h, 0.0).astype(jnp.bfloat16)
    h = jnp.dot(h, w2, preferred_element_type=jnp.float32) + b[1:2, :]
    h = jnp.maximum(h, 0.0).astype(jnp.bfloat16)
    o_ref[...] = jnp.dot(h, wl, preferred_element_type=jnp.float32) + b[2:3, :]


# --------------------------------------------------------------------------------------
# Parameter init (deterministic, PyTorch nn.Linear-style uniform), returned in float64
# so the offline weight composition does not accumulate fp32 rounding error.
# --------------------------------------------------------------------------------------
def _linear_params(key, fan_in, fan_out):
    kw, kb = jax.random.split(key)
    bound = 1.0 / np.sqrt(fan_in)
    w = jax.random.uniform(kw, (fan_in, fan_out), jnp.float32, -bound, bound)
    b = jax.random.uniform(kb, (1, fan_out), jnp.float32, -bound, bound)
    return np.asarray(w, np.float64), np.asarray(b, np.float64)


class PretrainedPallas:
    """JAX/Pallas re-implementation of PRETRAINED.forward (single fused, jitted kernel)."""

    IMAGENET_OUT_DIM = 1000
    POOL_GRID = 7  # synthetic backbone pools the 224x224 image into a 7x7 grid

    def __init__(self, key, out_dim=10, in_channel=1, img_sz=16, hidden_dim=32):
        self.in_channel = in_channel
        self.img_sz = img_sz
        self.z_dim = img_sz ** 2
        self.out_dim = out_dim
        H = W = img_sz
        P = self.POOL_GRID

        ks = jax.random.split(key, 5)
        bk_in = 3 * P * P
        # TODO(synk): the torchvision pretrained backbone cannot be reproduced without a
        # checkpoint; it is replaced by a deterministic 7x7 avg-pool + Linear(147,1000)
        # stand-in that still produces the 1000-dim feature consumed by embed_layer.
        w_bk, b_bk = _linear_params(ks[0], bk_in, self.IMAGENET_OUT_DIM)
        w_embed, b_embed = _linear_params(ks[1], self.IMAGENET_OUT_DIM, self.z_dim)
        w1, b1 = _linear_params(ks[2], self.z_dim, hidden_dim)
        w2, b2 = _linear_params(ks[3], hidden_dim, hidden_dim)
        w_last, b_last = _linear_params(ks[4], hidden_dim, out_dim)

        # ---- compose the separable pooling: AdaptiveAvgPool2d(224) then 7x7 block pool
        a_h7 = _adaptive_avg_pool_matrix(224, P) @ _adaptive_avg_pool_matrix(H, 224)  # (7, H)
        a_w7 = _adaptive_avg_pool_matrix(224, P) @ _adaptive_avg_pool_matrix(W, 224)  # (7, W)
        m_pool = np.kron(a_h7, a_w7)                                                  # (49, H*W)

        # ---- fold the channel repeat (in_channel==1 -> 3) into the backbone weight
        if in_channel == 1:
            w_bk_blocks = [w_bk[0:P * P] + w_bk[P * P:2 * P * P] + w_bk[2 * P * P:3 * P * P]]
        else:
            w_bk_blocks = [w_bk[c * P * P:(c + 1) * P * P] for c in range(in_channel)]
        w_img2feat = np.concatenate([m_pool.T @ blk for blk in w_bk_blocks], axis=0)  # (C*H*W, 1000)

        # ---- fold the whole linear prefix up to the first ReLU into one weight + bias
        w_pre = w_img2feat @ w_embed @ w1                      # (C*H*W, hidden)
        b_pre = (b_bk @ w_embed + b_embed) @ w1 + b1           # (1, hidden)

        # ---- lane-dense padding: hidden -> 128, out_dim -> 128, K -> multiple of 128
        k_pre = in_channel * H * W
        k_pad = -(-k_pre // LANE) * LANE
        self._k_pre, self._k_pad = k_pre, k_pad

        w_pre_p = np.zeros((k_pad, HIDP), np.float64)
        w_pre_p[:k_pre, :hidden_dim] = w_pre
        b_pre_p = np.zeros((1, HIDP), np.float64)
        b_pre_p[:, :hidden_dim] = b_pre

        w2_p = np.zeros((HIDP, HIDP), np.float64)
        w2_p[:hidden_dim, :hidden_dim] = w2
        b2_p = np.zeros((1, HIDP), np.float64)
        b2_p[:, :hidden_dim] = b2

        wl_p = np.zeros((HIDP, HIDP), np.float64)
        wl_p[:hidden_dim, :out_dim] = w_last
        bl_p = np.zeros((1, HIDP), np.float64)
        bl_p[:, :out_dim] = b_last

        # ---- pack into two slabs -> only 3 kernel inputs (x, weights, biases)
        w_slab = np.concatenate([w_pre_p, w2_p, wl_p], axis=0)   # (k_pad + 2*HIDP, HIDP)
        b_slab = np.concatenate([b_pre_p, b2_p, bl_p], axis=0)   # (3, HIDP)

        self.w_slab = jnp.asarray(w_slab, jnp.bfloat16)  # bf16 MXU operands
        self.b_slab = jnp.asarray(b_slab, jnp.float32)   # f32 bias-add / ReLU path

        kernel = functools.partial(_fused_forward_kernel, k_pad=k_pad, hidp=HIDP)
        out_dim_static = out_dim

        def _forward(x, w_slab, b_slab):
            B = x.shape[0]
            x_flat = x.reshape(B, -1).astype(jnp.bfloat16)
            if k_pad != k_pre:  # keep K a multiple of 128 (zero-pad extra columns)
                x_flat = jnp.pad(x_flat, ((0, 0), (0, k_pad - k_pre)))
            out_pad = pl.pallas_call(
                kernel,
                out_shape=jax.ShapeDtypeStruct((B, HIDP), jnp.float32),
            )(x_flat, w_slab, b_slab)
            return out_pad[:, :out_dim_static]

        # One jit over reshape/cast/pad -> pallas_call -> slice: single dispatch end-to-end.
        self._forward = jax.jit(_forward)

    def __call__(self, x):
        return self._forward(x, self.w_slab, self.b_slab)


if __name__ == "__main__":
    key = jax.random.PRNGKey(0)
    k_param, k_data = jax.random.split(key)

    B, C, IMG = 2, 1, 16
    model = PretrainedPallas(k_param, out_dim=10, in_channel=C, img_sz=IMG, hidden_dim=32)

    x = jax.random.normal(k_data, (B, C, IMG, IMG), dtype=jnp.float32)
    out = model(x)
    jax.block_until_ready(out)
    assert out.shape == (B, 10) and out.dtype == jnp.float32
    print("KERNEL_OK")
</pallas_src>

<mosaic_0001>
module attributes {stable_mosaic.version = 11 : i64} {
  func.func @_fused_forward_kernel(%arg0: memref<2x256xbf16, #tpu.memory_space<vmem>>, %arg1: memref<512x128xbf16, #tpu.memory_space<vmem>>, %arg2: memref<3x128xf32, #tpu.memory_space<vmem>>, %arg3: memref<2x128xf32, #tpu.memory_space<vmem>>) attributes {dimension_semantics = [], scalar_prefetch = 0 : i64, scratch_operands = 0 : i64, tpu.core_type = #tpu.core_type<tc>} {
    %c0 = arith.constant 0 : index
    %c0_0 = arith.constant 0 : index
    %0 = vector.load %arg2[%c0, %c0_0] : memref<3x128xf32, #tpu.memory_space<vmem>>, vector<3x128xf32>
    %c0_1 = arith.constant 0 : index
    %c0_2 = arith.constant 0 : index
    %1 = vector.load %arg1[%c0_1, %c0_2] : memref<512x128xbf16, #tpu.memory_space<vmem>>, vector<256x128xbf16>
    %c256 = arith.constant 256 : index
    %c0_3 = arith.constant 0 : index
    %2 = vector.load %arg1[%c256, %c0_3] : memref<512x128xbf16, #tpu.memory_space<vmem>>, vector<128x128xbf16>
    %c384 = arith.constant 384 : index
    %c0_4 = arith.constant 0 : index
    %3 = vector.load %arg1[%c384, %c0_4] : memref<512x128xbf16, #tpu.memory_space<vmem>>, vector<128x128xbf16>
    %c0_5 = arith.constant 0 : index
    %c0_6 = arith.constant 0 : index
    %4 = vector.load %arg0[%c0_5, %c0_6] : memref<2x256xbf16, #tpu.memory_space<vmem>>, vector<2x256xbf16>
    %cst = arith.constant dense<0.000000e+00> : vector<2x128xf32>
    %5 = tpu.matmul %4, %1, %cst {dimension_numbers = #tpu.dot_dimension_numbers<[1], [0], [0], [1], [0, 0, 1, 1], [], []>} : vector<2x256xbf16>, vector<256x128xbf16>, vector<2x128xf32> -> vector<2x128xf32>
    %6 = vector.extract_strided_slice %0 {offsets = [0, 0], sizes = [1, 128], strides = [1, 1]} : vector<3x128xf32> to vector<1x128xf32>
    %7 = vector.broadcast %6 : vector<1x128xf32> to vector<2x128xf32>
    %8 = arith.addf %5, %7 : vector<2x128xf32>
    %cst_7 = arith.constant 0.000000e+00 : f32
    %9 = vector.broadcast %cst_7 : f32 to vector<2x128xf32>
    %10 = arith.maximumf %8, %9 : vector<2x128xf32>
    %11 = arith.truncf %10 : vector<2x128xf32> to vector<2x128xbf16>
    %cst_8 = arith.constant dense<0.000000e+00> : vector<2x128xf32>
    %12 = tpu.matmul %11, %2, %cst_8 {dimension_numbers = #tpu.dot_dimension_numbers<[1], [0], [0], [1], [0, 0, 1, 1], [], []>} : vector<2x128xbf16>, vector<128x128xbf16>, vector<2x128xf32> -> vector<2x128xf32>
    %13 = vector.extract_strided_slice %0 {offsets = [1, 0], sizes = [1, 128], strides = [1, 1]} : vector<3x128xf32> to vector<1x128xf32>
    %14 = vector.broadcast %13 : vector<1x128xf32> to vector<2x128xf32>
    %15 = arith.addf %12, %14 : vector<2x128xf32>
    %cst_9 = arith.constant 0.000000e+00 : f32
    %16 = vector.broadcast %cst_9 : f32 to vector<2x128xf32>
    %17 = arith.maximumf %15, %16 : vector<2x128xf32>
    %18 = arith.truncf %17 : vector<2x128xf32> to vector<2x128xbf16>
    %cst_10 = arith.constant dense<0.000000e+00> : vector<2x128xf32>
    %19 = tpu.matmul %18, %3, %cst_10 {dimension_numbers = #tpu.dot_dimension_numbers<[1], [0], [0], [1], [0, 0, 1, 1], [], []>} : vector<2x128xbf16>, vector<128x128xbf16>, vector<2x128xf32> -> vector<2x128xf32>
    %20 = vector.extract_strided_slice %0 {offsets = [2, 0], sizes = [1, 128], strides = [1, 1]} : vector<3x128xf32> to vector<1x128xf32>
    %21 = vector.broadcast %20 : vector<1x128xf32> to vector<2x128xf32>
    %22 = arith.addf %19, %21 : vector<2x128xf32>
    %c0_11 = arith.constant 0 : index
    %c0_12 = arith.constant 0 : index
    %23 = vector.load %arg3[%c0_11, %c0_12] : memref<2x128xf32, #tpu.memory_space<vmem>>, vector<2x128xf32>
    tpu.vector_store %arg3[%c0_11, %c0_12], %22 {strides = array<i32>} : memref<2x128xf32, #tpu.memory_space<vmem>>, vector<2x128xf32>,
    return
  }
}

</mosaic_0001>

<bundles_post_ra>
// kernel: _forward.1
= control target key start
LH: loop header
LB: loop body
LE: loop exit
PB: predicated region body
PF: predicated region fallthrough
CT: control target
= control target key end

     0   :  { %8 = vsyncpa [#allocation3], 0  ;;  %s724_s0 = inlined_call_operand.vmem [shape: bf16[2,256], index: 0, kind: input, shape index: {}]   ;;  %s725_s1 = inlined_call_operand.hbm [shape: bf16[512,128], index: 1, kind: input, shape index: {}]   ;;  %s726_s2 = inlined_call_operand.vmem [shape: f32[3,128], index: 2, kind: input, shape index: {}]   ;;  %s727_s3 = inlined_call_operand.hbm [shape: f32[2,128], index: 3, kind: output, shape index: {}]  }
   0x1   :  { %9 = vsyncpa [#allocation4], 0  ;;  %s661_s12 = smov [#allocation2]  }
   0x2   :  { %s17_s13 = sshll.u32 %s661_s12, 4  ;;  %s18_s13 = int_to_ptr.vmem [resolvable:$true] %s17_s13 }
   0x3   :  { %s625_s14 = scalar_lea.vmem %s18_s13, 4096  ;;  %p630_p1 = scmp.lt.s32.totalorder %s18_s13, %s18_s13 }
   0x4   :  { %p626_p0 = scmp.ne.s32.totalorder %s18_s13, %s625_s14  ;;  %p631_p2 = scmp.lt.s32.totalorder %s625_s14, %s625_s14 }
   0x6   :  { %p632_p3 = por %p631_p2, %p630_p1 }
   0x8   :  { %p633_p4 = pnand %p632_p3, %p626_p0 }
   0xa   :  { %636 = shalt.err (!%p633_p4)
}
   0xb   :  { %s662_s15 = smov 64   ;;  %s663_s16 = smov 4  }
   0xc   :  { %23 = dma.hbm_to_vmem [thread:$0]  %s725_s1, 4096, %s18_s13, [#allocation3], %s662_s15, %s662_s15, %s663_s16  }
   0xd   :  { %657 = dma.done.wait [#allocation3], 4096  }
   0xe   :  { %658 = vsyncadd [#allocation3], 4294963200  ;;  %v664_v0 = vmov 0.0   ;;  %v585_v1 = vld [vmem:[#allocation2 + $0x78] sm:$0xff]   ;;  %v587_v3 = vld [vmem:[#allocation2 + $0x70] sm:$0xff]   ;;  %v96_v7 = vlaneseq  ;;  %vm666_vm0 = vmmov 0  }
   0xf   :  { %538 = vmatprep.subr.bf16.mxu1 %v664_v0  ;;  %v586_v2 = vld [vmem:[#allocation2 + $0x38] sm:$0xff]   ;;  %498 = vmatprep.subr.bf16.mxu0 %v585_v1  ;;  %v588_v4 = vld [vmem:[#allocation2 + $0x30] sm:$0xff]   ;;  %v589_v5 = vld [vmem:[#allocation2 + $0x68] sm:$0xff]   ;;  %v665_v8 = vmov 1966171168  }
  0x10   :  { %499 = vmatpush3.bf16.msra.mxu0 %v586_v2  ;;  %v590_v6 = vld [vmem:[#allocation2 + $0x28] sm:$0xff]   ;;  %v110_v9 = vunpack.c.l.s4 %v665_v8  ;;  %v591_v10 = vld [vmem:[#allocation2 + $0x60] sm:$0xff]   ;;  %v692_v12 = vshrl.u32 %v96_v7, 7  ;;  %v593_v14 = vld [vmem:[#allocation2 + $0x58] sm:$0xff]   ;;  %554 = vmatprep.mubr.msk.bf16.mxu1 %vm666_vm0, %v664_v0 }
  0x11   :  { %500 = vmatprep.subr.bf16.mxu0 %v587_v3  ;;  %v592_v11 = vld [vmem:[#allocation2 + $0x20] sm:$0xff]   ;;  %v594_v15 = vld [vmem:[#allocation2 + $0x18] sm:$0xff]   ;;  %v595_v16 = vld [vmem:[#allocation2 + $0x50] sm:$0xff]  }
  0x12   :  { %v111_v13 = vunpack.c.0.s8 %v110_v9  ;;  %v465_v18 = vld.sshfl [vmem:[%s724_s0] sm:$0x11 pattern:$0x75316420]  ;;  %v601_v20 = vld [vmem:[#allocation2 + $0xb8] sm:$0xff]   ;;  %v596_v21 = vld [vmem:[#allocation2 + $0x10] sm:$0xff]  }
  0x13   :  { %v108_v19 = vcombine.high %v465_v18, %v465_v18  ;;  %539 = vmatpush3.bf16.msra.mxu1 %v601_v20  ;;  %v602_v23 = vld [vmem:[#allocation2 + $0xb0] sm:$0xff]   ;;  %v597_v24 = vld [vmem:[#allocation2 + $0x48] sm:$0xff]   ;;  %v599_v27 = vld [vmem:[#allocation2 + $0x40] sm:$0xff]   ;;  %v98_v41 = vsub.s32 0, %v692_v12  ;;  %v265_v54 = vsub.s32 1, %v692_v12  ;;  %v359_v63 = vsub.s32 2, %v692_v12 }
  0x14   :  { %501 = vmatpush3.bf16.msra.mxu0 %v588_v4  ;;  %v114_v17 = vsub.s32 %v111_v13, %v692_v12  ;;  %540 = vmatprep.subr.bf16.mxu1 %v664_v0  ;;  %v598_v25 = vld [vmem:[#allocation2 + $0x8] sm:$0xff]   ;;  %v600_v28 = vld [vmem:[#allocation2] sm:$0xff]   ;;  %v605_v31 = vld [vmem:[#allocation2 + $0x98] sm:$0xff]  }
  0x15   :  { %502 = vmatprep.subr.bf16.mxu0 %v589_v5  ;;  %v603_v26 = vld [vmem:[#allocation2 + $0xa8] sm:$0xff]   ;;  %v604_v29 = vld [vmem:[#allocation2 + $0xa0] sm:$0xff]   ;;  %v606_v32 = vld [vmem:[#allocation2 + $0x90] sm:$0xff]  }
  0x16   :  { %v122_v22 = vrot.slane %v108_v19, %v114_v17  ;;  %v115_v30 = vrot.slane %v465_v18, %v114_v17  ;;  %v607_v33 = vld [vmem:[#allocation2 + $0x88] sm:$0xff]   ;;  %v608_v34 = vld [vmem:[#allocation2 + $0x80] sm:$0xff]   ;;  %v609_v35 = vld [vmem:[#allocation2 + $0xf8] sm:$0xff]  }
  0x17   :  { %541 = vmatpush3.bf16.msra.mxu1 %v602_v23  ;;  %v610_v36 = vld [vmem:[#allocation2 + $0xf0] sm:$0xff]   ;;  %v611_v37 = vld [vmem:[#allocation2 + $0xe8] sm:$0xff]   ;;  %v612_v38 = vld [vmem:[#allocation2 + $0xe0] sm:$0xff]  }
  0x18   :  { %503 = vmatpush3.bf16.msra.mxu0 %v590_v6  ;;  %253 = vmatprep.mubr.bf16.mxu0 %v122_v22  ;;  %v613_v39 = vld [vmem:[#allocation2 + $0xd8] sm:$0xff]   ;;  %v614_v40 = vld [vmem:[#allocation2 + $0xd0] sm:$0xff]   ;;  %v30_v42 = vld [vmem:[%s726_s2] sm:$0x7]  ;;  %s667_s2 = smov [#allocation5]  }
  0x19   :  { %504 = vmatprep.subr.bf16.mxu0 %v591_v10  ;;  %542 = vmatprep.subr.bf16.mxu1 %v664_v0  ;;  %v99_v44 = vrot.slane %v30_v42, %v98_v41  ;;  %v615_v52 = vld [vmem:[#allocation2 + $0xc8] sm:$0xff]   ;;  %v616_v53 = vld [vmem:[#allocation2 + $0xc0] sm:$0xff]   ;;  %v266_v55 = vrot.slane %v30_v42, %v265_v54  ;;  %v360_v1 = vrot.slane %v30_v42, %v359_v63  ;;  %s456_s21 = sshll.u32 %s667_s2, 4  ;;  %s457_s21 = int_to_ptr.vmem [resolvable:$true] %s456_s21 }
  0x1a   :  { %s637_s22 = scalar_lea.vmem %s457_s21, 32  ;;  %p642_p6 = scmp.lt.s32.totalorder %s457_s21, %s457_s21 }
  0x1b   :  { %543 = vmatpush3.bf16.msra.mxu1 %v603_v26  ;;  %p638_p5 = scmp.ne.s32.totalorder %s457_s21, %s637_s22  ;;  %p643_p7 = scmp.lt.s32.totalorder %s637_s22, %s637_s22 }
  0x1c   :  { %505 = vmatpush3.bf16.msra.mxu0 %v592_v11  ;;  %544 = vmatprep.subr.bf16.mxu1 %v664_v0 }
  0x1d   :  { %506 = vmatprep.subr.bf16.mxu0 %v593_v14  ;;  %p644_p8 = por %p643_p7, %p642_p6 }
  0x1f   :  { %545 = vmatpush3.bf16.msra.mxu1 %v604_v29  ;;  %p645_p9 = pnand %p644_p8, %p638_p5 }
  0x20   :  { %507 = vmatpush3.bf16.msra.mxu0 %v594_v15  ;;  %546 = vmatprep.subr.bf16.mxu1 %v664_v0 }
  0x21   :  { %508 = vmatprep.subr.bf16.mxu0 %v595_v16 }
  0x23   :  { %547 = vmatpush3.bf16.msra.mxu1 %v605_v31 }
  0x24   :  { %509 = vmatpush3.bf16.msra.mxu0 %v596_v21  ;;  %548 = vmatprep.subr.bf16.mxu1 %v664_v0 }
  0x25   :  { %510 = vmatprep.subr.bf16.mxu0 %v597_v24 }
  0x27   :  { %549 = vmatpush3.bf16.msra.mxu1 %v606_v32 }
  0x28   :  { %511 = vmatpush3.bf16.msra.mxu0 %v598_v25  ;;  %550 = vmatprep.subr.bf16.mxu1 %v664_v0 }
  0x29   :  { %512 = vmatprep.subr.bf16.mxu0 %v599_v27 }
  0x2b   :  { %551 = vmatpush3.bf16.msra.mxu1 %v607_v33 }
  0x2c   :  { %513 = vmatpush3.bf16.msra.mxu0 %v600_v28  ;;  %552 = vmatprep.subr.bf16.mxu1 %v664_v0 }
  0x2d   :  { %558 = vmatprep.subr.bf16.mxu0 %v664_v0 }
  0x2f   :  { %254 = vmatmul.mubr.bf16.vlgmr.msra.gmra.mxu0 %v115_v30  ;;  %553 = vmatpush3.bf16.msra.mxu1 %v608_v34 }
  0x30   :  { %574 = vmatprep.mubr.msk.bf16.mxu0 %vm666_vm0, %v664_v0  ;;  %559 = vmatpush3.bf16.msra.mxu0 %v609_v35 }
  0x31   :  { %560 = vmatprep.subr.bf16.mxu0 %v664_v0 }
  0x34   :  { %561 = vmatpush3.bf16.msra.mxu0 %v610_v36 }
  0x35   :  { %562 = vmatprep.subr.bf16.mxu0 %v664_v0 }
  0x38   :  { %563 = vmatpush3.bf16.msra.mxu0 %v611_v37 }
  0x39   :  { %564 = vmatprep.subr.bf16.mxu0 %v664_v0 }
  0x3c   :  { %565 = vmatpush3.bf16.msra.mxu0 %v612_v38 }
  0x3d   :  { %566 = vmatprep.subr.bf16.mxu0 %v664_v0 }
  0x40   :  { %567 = vmatpush3.bf16.msra.mxu0 %v613_v39 }
  0x41   :  { %568 = vmatprep.subr.bf16.mxu0 %v664_v0 }
  0x44   :  { %569 = vmatpush3.bf16.msra.mxu0 %v614_v40 }
  0x45   :  { %570 = vmatprep.subr.bf16.mxu0 %v664_v0 }
  0x48   :  { %571 = vmatpush3.bf16.msra.mxu0 %v615_v52 }
  0x49   :  { %572 = vmatprep.subr.bf16.mxu0 %v664_v0 }
  0x4c   :  { %573 = vmatpush3.bf16.msra.mxu0 %v616_v53 }
  0xef   :  { %v514_v43 = vpop.f32.mrf.mxu0 }
  0xf1   :  { %v515_v45 = vpop.f32.mrf.mxu0 }
  0xf2   :  { %v516_v46 = vadd.f32 %v515_v45, %v514_v43 }
  0xf3   :  { %v517_v47 = vpop.f32.mrf.mxu0 }
  0xf4   :  { %v256_v48 = vadd.f32 %v516_v46, %v99_v44 }
  0xf5   :  { %v518_v49 = vpop.f32.mrf.mxu0 }
  0xf6   :  { %v261_v50 = vmax.f32 %v256_v48, 0.0 }
  0xf8   :  { %v262_v51 = vpack.c.bf16 %v261_v50, %v261_v50 }
  0xfa   :  { %555 = vmatmul.mubr.bf16.vlgmr.msra.gmra.mxu1 %v262_v51 }
 0x1ba   :  { %v349_v56 = vpop.f32.mrf.mxu1 }
 0x1bb   :  { %v350_v57 = vadd.f32 %v349_v56, %v266_v55 }
 0x1bc   :  { %v556_v58 = vpop.f32.mrf.mxu1 }
 0x1bd   :  { %v355_v59 = vmax.f32 %v350_v57, 0.0 }
 0x1be   :  { %v352_v60 = vpop.f32.mrf.mxu1 }
 0x1bf   :  { %v356_v61 = vpack.c.bf16 %v355_v59, %v355_v59 }
 0x1c0   :  { %v557_v62 = vpop.f32.mrf.mxu1 }
 0x1c1   :  { %575 = vmatmul.mubr.bf16.vlgmr.msra.gmra.mxu0 %v356_v61 }
 0x281   :  { %v443_v2 = vpop.f32.mrf.mxu0 }
 0x282   :  { %v444_v0 = vadd.f32 %v443_v2, %v360_v1 }
 0x283   :  { %v576_v3 = vpop.f32.mrf.mxu0 }
 0x284   :  { %449 = vst [vmem:[#allocation5] sm:$0x3] %v444_v0 }
 0x285   :  { %v446_v4 = vpop.f32.mrf.mxu0 }
 0x286   :  { %648 = shalt.err (!%p645_p9)
}
 0x287   :  { %459 = dma.vmem_to_hbm [thread:$0]  %s457_s21, 32, %s727_s3, [#allocation4]   ;;  %v577_v5 = vpop.f32.mrf.mxu0 }
 0x288   :  { %659 = dma.done.wait [#allocation4], 32  }
 0x289   :  { %660 = vsyncadd [#allocation4], 4294967264 }
 0x28a   :  { %463 = vsyncpa [#allocation3], 1 }
 0x28b   :  { %464 = vsyncpa [#allocation4], 1 }

</bundles_post_ra>
